<compile_context>
chip_gen: v5e
topology: v5e:2x2
jax: 0.10.0
libtpu: 0.0.40
codegen_flags: <defaults>
</compile_context>

<pallas_src>
import functools

import jax
import jax.numpy as jnp
from jax.experimental import pallas as pl
from jax.experimental.pallas import tpu as pltpu


# ---------------------------------------------------------------------------
# Kernel
# ---------------------------------------------------------------------------
def _ffn_fused_kernel(x_ref, w13_ref, w2_ref, o_ref, acc_ref):
    """One grid step: acc += (silu(x @ W1_h) * (x @ W3_h)) @ W2_h  for H chunk h."""
    h = pl.program_id(1)

    @pl.when(h == 0)
    def _():
        acc_ref[...] = jnp.zeros_like(acc_ref)

    x = x_ref[...]                                                     # (tm, D)
    # w13_ref is the stacked (2, D, th) chunk: one DMA stream for both weights.
    g = jnp.dot(x, w13_ref[0], preferred_element_type=jnp.float32)     # (tm, th)
    v = jnp.dot(x, w13_ref[1], preferred_element_type=jnp.float32)     # (tm, th)
    # SwiGLU epilogue in f32; sigmoid runs on the EUP slot (off the VALU path).
    hact = g * jax.nn.sigmoid(g) * v
    acc_ref[...] += jnp.dot(hact.astype(w2_ref.dtype), w2_ref[...],
                            preferred_element_type=jnp.float32)

    @pl.when(h == pl.num_programs(1) - 1)
    def _():
        o_ref[...] = acc_ref[...].astype(o_ref.dtype)


# ---------------------------------------------------------------------------
# Tiling / VMEM helpers
# ---------------------------------------------------------------------------
def _sublane_align(dtype):
    """Second-to-last-dim tile multiple for the dtype (8 f32, 16 bf16, 32 int8)."""
    return max(8, 32 // jnp.dtype(dtype).itemsize)


def _choose_tile(n, target, align, prefer=None):
    """Pick a tile for an axis of extent n.  Returns (tile, padded_n).

    Preference: full extent (n <= target) -> largest `prefer`-aligned divisor
    -> largest `align`-aligned divisor -> aligned target tile + zero padding.
    The full-extent fallback for n > target is never used (avoids VMEM blow-ups).
    """
    if n <= target:
        return n, n
    for a in (prefer, align):
        if not a:
            continue
        t = (target // a) * a
        while t >= a:
            if n % t == 0:
                return t, n
            t -= a
    t = max(align, (target // align) * align)
    return t, ((n + t - 1) // t) * t


def _vmem_bytes(tm, th, d, esize):
    """Double-buffered I/O blocks + resident f32 accumulator."""
    io = tm * d * esize          # x block
    io += 2 * d * th * esize     # stacked W1/W3 block
    io += th * d * esize         # W2 block
    io += tm * d * esize         # output block
    return 2 * io + tm * d * 4


@functools.lru_cache(maxsize=1)
def _vmem_budget_bytes():
    """~5/8 of physical VMEM: ~40 MiB on v7x (64 MiB), ~80 MiB on v5e/v6e (128 MiB)."""
    cap = 64 * 1024 * 1024  # conservative default if the query is unavailable
    try:
        cap = int(getattr(pltpu.get_tpu_info(), "vmem_capacity_bytes", cap)) or cap
    except Exception:
        pass
    return (cap * 5) // 8


def _fit_tiles(m, h, d, esize, align_m, budget, tm_target, th_target):
    tm_t, th_t = tm_target, th_target
    while True:
        tm, m_pad = _choose_tile(m, tm_t, align_m)
        th, h_pad = _choose_tile(h, th_t, 128, prefer=256)  # 256-aligned for v6e/v7x MXU
        if _vmem_bytes(tm, th, d, esize) <= budget:
            return tm, m_pad, th, h_pad
        # Shrink th first: x stays VMEM-resident across the H axis, so a smaller th
        # costs no extra HBM traffic.  Shrinking tm adds weight re-streaming.
        if th_t > 256:
            th_t //= 2
        elif tm_t > align_m:
            tm_t = max(align_m, tm_t // 2)
        elif th_t > 128:
            th_t //= 2
        else:
            return tm, m_pad, th, h_pad  # best effort; vmem_limit keeps headroom


# ---------------------------------------------------------------------------
# Module forward
# ---------------------------------------------------------------------------
def fuse_gate_up_weights(w1_t, w3_t):
    """One-time weight prep (do this at load time): stack the (D, H) gate/value
    projections into a single (2, D, H) tensor -> one weight DMA stream per chunk."""
    return jnp.stack([w1_t, w3_t], axis=0)


def feedforward_forward(x, w13, w2_t, *, tm=512, th=512):
    """y = (silu(x @ W1) * (x @ W3)) @ W2   (eval mode: ffn_dropout = identity).

    x:    (B, S, D)
    w13:  (2, D, H)  from fuse_gate_up_weights(w1.weight.T, w3.weight.T)
    w2_t: (H, D)     w2.weight transposed to (in, out)
    """
    B, S, D = x.shape
    H = w13.shape[2]
    M = B * S
    x2 = x.reshape(M, D)
    esize = jnp.dtype(x.dtype).itemsize
    w_esize = jnp.dtype(w2_t.dtype).itemsize
    align_m = _sublane_align(x.dtype)

    budget = _vmem_budget_bytes()
    tm, m_pad, th, h_pad = _fit_tiles(M, H, D, esize, align_m, budget, tm, th)

    if m_pad != M:
        x2 = jnp.pad(x2, ((0, m_pad - M), (0, 0)))
    if h_pad != H:
        # Zero-padded hidden units contribute silu(0) * 0 @ W2 = 0: exact.
        w13 = jnp.pad(w13, ((0, 0), (0, 0), (0, h_pad - H)))
        w2_t = jnp.pad(w2_t, ((0, h_pad - H), (0, 0)))

    n_i, n_h = m_pad // tm, h_pad // th
    # NOTE: for decode-sized M (single M tile) we deliberately do NOT split M to
    # occupy both v7x TCs: that would double weight streaming on an HBM-bound op.

    y2 = pl.pallas_call(
        _ffn_fused_kernel,
        out_shape=jax.ShapeDtypeStruct((m_pad, D), x.dtype),
        grid=(n_i, n_h),
        in_specs=[
            pl.BlockSpec((tm, D), lambda i, h: (i, 0)),        # x: resident across h
            pl.BlockSpec((2, D, th), lambda i, h: (0, 0, h)),  # stacked W1/W3 chunk
            pl.BlockSpec((th, D), lambda i, h: (h, 0)),        # W2 chunk
        ],
        out_specs=pl.BlockSpec((tm, D), lambda i, h: (i, 0)),  # resident accumulator
        scratch_shapes=[pltpu.VMEM((tm, D), jnp.float32)],
        compiler_params=pltpu.CompilerParams(
            dimension_semantics=("parallel", "arbitrary"),
            vmem_limit_bytes=int(budget),
        ),
        cost_estimate=pl.CostEstimate(
            flops=6 * m_pad * h_pad * D + 4 * m_pad * h_pad,
            transcendentals=m_pad * h_pad,
            bytes_accessed=(2 * m_pad * D * esize              # x in + y out (once)
                            + n_i * 3 * D * h_pad * w_esize),  # weights per M tile
        ),
    )(x2, w13, w2_t)

    if m_pad != M:
        y2 = y2[:M]
    # TODO(synk): training-mode ffn_dropout not modeled (module runs in eval mode).
    return y2.reshape(B, S, D)


# ---------------------------------------------------------------------------
# Pure-JAX reference (for correctness checking)
# ---------------------------------------------------------------------------
def feedforward_reference(x, w1_t, w3_t, w2_t):
    g = jnp.einsum("bsd,dh->bsh", x, w1_t)
    v = jnp.einsum("bsd,dh->bsh", x, w3_t)
    return jnp.einsum("bsh,hd->bsd", jax.nn.silu(g) * v, w2_t)


def find_multiple(n: int, k: int):
    if n % k == 0:
        return n
    return n + k - n % k


def _make_inputs(key, B, S, dim, multiple_of, dtype=jnp.float32):
    hidden = find_multiple(int(2 * (4 * dim) / 3), multiple_of)
    kx, k1, k3, k2 = jax.random.split(key, 4)
    x = jax.random.normal(kx, (B, S, dim), dtype=dtype)
    # nn.Linear weights are (out, in); store transposed as (in, out).
    w1_t = (0.05 * jax.random.normal(k1, (dim, hidden))).astype(dtype)
    w3_t = (0.05 * jax.random.normal(k3, (dim, hidden))).astype(dtype)
    w2_t = (0.05 * jax.random.normal(k2, (hidden, dim))).astype(dtype)
    return x, w1_t, w3_t, w2_t


# ---------------------------------------------------------------------------
if __name__ == "__main__":
    key = jax.random.PRNGKey(0)
    configs = [
        # (B, S, dim, multiple_of): hidden = find_multiple(int(8*dim/3), multiple_of)
        (2, 8, 32, 32),       # tiny module config (dim=32 -> hidden=96), 1 grid step
        (2, 512, 256, 128),   # dim=256 -> hidden=768: grid (M/tm=2, H/th=3) exercises
                              # M tiling + multi-step H reduction into the accumulator
    ]
    for idx, (B, S, dim, mult) in enumerate(configs):
        key, sub = jax.random.split(key)
        x, w1_t, w3_t, w2_t = _make_inputs(sub, B, S, dim, mult)
        w13 = fuse_gate_up_weights(w1_t, w3_t)      # one-time weight prep
        y = jax.block_until_ready(feedforward_forward(x, w13, w2_t))
        y_ref = jax.block_until_ready(feedforward_reference(x, w1_t, w3_t, w2_t))
        assert y.shape == x.shape
        err = float(jnp.max(jnp.abs(y - y_ref)))
        assert jnp.allclose(y, y_ref, atol=2e-3, rtol=2e-3), (
            f"config {idx}: mismatch vs reference (max abs err = {err})")
    print("KERNEL_OK")
</pallas_src>

<mosaic_0001>
module attributes {stable_mosaic.version = 11 : i64} {
  func.func @_ffn_fused_kernel(%arg0: i32, %arg1: i32, %arg2: memref<16x32xf32, #tpu.memory_space<vmem>>, %arg3: memref<2x32x96xf32, #tpu.memory_space<vmem>>, %arg4: memref<96x32xf32, #tpu.memory_space<vmem>>, %arg5: memref<16x32xf32, #tpu.memory_space<vmem>>, %arg6: memref<16x32xf32, #tpu.memory_space<vmem>>) attributes {dimension_semantics = [#tpu.dimension_semantics<parallel>, #tpu.dimension_semantics<arbitrary>], iteration_bounds = array<i64: 1, 1>, scalar_prefetch = 0 : i64, scratch_operands = 1 : i64, tpu.core_type = #tpu.core_type<tc>, window_params = [{transform_indices = @transform_0, window_bounds = array<i64: 16, 32>}, {transform_indices = @transform_1, window_bounds = array<i64: 2, 32, 96>}, {transform_indices = @transform_2, window_bounds = array<i64: 96, 32>}, {transform_indices = @transform_3, window_bounds = array<i64: 16, 32>}]} {
    %c0_i32 = arith.constant 0 : i32
    %0 = arith.cmpi eq, %arg1, %c0_i32 : i32
    %1 = arith.extui %0 : i1 to i32
    %c0_i32_0 = arith.constant 0 : i32
    %2 = arith.cmpi ne, %1, %c0_i32_0 : i32
    scf.if %2 {
      %cst_18 = arith.constant 0.000000e+00 : f32
      %25 = vector.broadcast %cst_18 : f32 to vector<16x32xf32>
      %c0_19 = arith.constant 0 : index
      %c0_20 = arith.constant 0 : index
      %26 = vector.load %arg6[%c0_19, %c0_20] : memref<16x32xf32, #tpu.memory_space<vmem>>, vector<16x32xf32>
      tpu.vector_store %arg6[%c0_19, %c0_20], %25 {strides = array<i32>} : memref<16x32xf32, #tpu.memory_space<vmem>>, vector<16x32xf32>,
    } else {
    }
    %c0 = arith.constant 0 : index
    %c0_1 = arith.constant 0 : index
    %3 = vector.load %arg2[%c0, %c0_1] : memref<16x32xf32, #tpu.memory_space<vmem>>, vector<16x32xf32>
    %c0_2 = arith.constant 0 : index
    %c0_3 = arith.constant 0 : index
    %c0_4 = arith.constant 0 : index
    %4 = vector.load %arg3[%c0_2, %c0_3, %c0_4] : memref<2x32x96xf32, #tpu.memory_space<vmem>>, vector<1x32x96xf32>
    %5 = vector.shape_cast %4 : vector<1x32x96xf32> to vector<32x96xf32>
    %cst = arith.constant dense<0.000000e+00> : vector<16x96xf32>
    %6 = tpu.matmul %3, %5, %cst {dimension_numbers = #tpu.dot_dimension_numbers<[1], [0], [0], [1], [0, 0, 1, 1], [], []>} : vector<16x32xf32>, vector<32x96xf32>, vector<16x96xf32> -> vector<16x96xf32>
    %c1 = arith.constant 1 : index
    %c0_5 = arith.constant 0 : index
    %c0_6 = arith.constant 0 : index
    %7 = vector.load %arg3[%c1, %c0_5, %c0_6] : memref<2x32x96xf32, #tpu.memory_space<vmem>>, vector<1x32x96xf32>
    %8 = vector.shape_cast %7 : vector<1x32x96xf32> to vector<32x96xf32>
    %cst_7 = arith.constant dense<0.000000e+00> : vector<16x96xf32>
    %9 = tpu.matmul %3, %8, %cst_7 {dimension_numbers = #tpu.dot_dimension_numbers<[1], [0], [0], [1], [0, 0, 1, 1], [], []>} : vector<16x32xf32>, vector<32x96xf32>, vector<16x96xf32> -> vector<16x96xf32>
    %10 = arith.negf %6 : vector<16x96xf32>
    %11 = math.exp %10 : vector<16x96xf32>
    %cst_8 = arith.constant 1.000000e+00 : f32
    %12 = vector.broadcast %cst_8 : f32 to vector<16x96xf32>
    %13 = arith.addf %12, %11 : vector<16x96xf32>
    %14 = arith.divf %12, %13 : vector<16x96xf32>
    %15 = arith.mulf %6, %14 : vector<16x96xf32>
    %16 = arith.mulf %15, %9 : vector<16x96xf32>
    %c0_9 = arith.constant 0 : index
    %c0_10 = arith.constant 0 : index
    %17 = vector.load %arg6[%c0_9, %c0_10] : memref<16x32xf32, #tpu.memory_space<vmem>>, vector<16x32xf32>
    %c0_11 = arith.constant 0 : index
    %c0_12 = arith.constant 0 : index
    %18 = vector.load %arg4[%c0_11, %c0_12] : memref<96x32xf32, #tpu.memory_space<vmem>>, vector<96x32xf32>
    %cst_13 = arith.constant dense<0.000000e+00> : vector<16x32xf32>
    %19 = tpu.matmul %16, %18, %cst_13 {dimension_numbers = #tpu.dot_dimension_numbers<[1], [0], [0], [1], [0, 0, 1, 1], [], []>} : vector<16x96xf32>, vector<96x32xf32>, vector<16x32xf32> -> vector<16x32xf32>
    %20 = arith.addf %17, %19 : vector<16x32xf32>
    %c0_14 = arith.constant 0 : index
    %c0_15 = arith.constant 0 : index
    %21 = vector.load %arg6[%c0_14, %c0_15] : memref<16x32xf32, #tpu.memory_space<vmem>>, vector<16x32xf32>
    tpu.vector_store %arg6[%c0_14, %c0_15], %20 {strides = array<i32>} : memref<16x32xf32, #tpu.memory_space<vmem>>, vector<16x32xf32>,
    %c0_i32_16 = arith.constant 0 : i32
    %22 = arith.cmpi eq, %arg1, %c0_i32_16 : i32
    %23 = arith.extui %22 : i1 to i32
    %c0_i32_17 = arith.constant 0 : i32
    %24 = arith.cmpi ne, %23, %c0_i32_17 : i32
    scf.if %24 {
      %c0_18 = arith.constant 0 : index
      %c0_19 = arith.constant 0 : index
      %25 = vector.load %arg6[%c0_18, %c0_19] : memref<16x32xf32, #tpu.memory_space<vmem>>, vector<16x32xf32>
      %c0_20 = arith.constant 0 : index
      %c0_21 = arith.constant 0 : index
      %26 = vector.load %arg5[%c0_20, %c0_21] : memref<16x32xf32, #tpu.memory_space<vmem>>, vector<16x32xf32>
      tpu.vector_store %arg5[%c0_20, %c0_21], %25 {strides = array<i32>} : memref<16x32xf32, #tpu.memory_space<vmem>>, vector<16x32xf32>,
    } else {
    }
    return
  }
  func.func @transform_0(%arg0: i32, %arg1: i32) -> (i32, i32) {
    %c0_i32 = arith.constant 0 : i32
    %c0_i32_0 = arith.constant 0 : i32
    return %arg0, %c0_i32 : i32, i32
  }
  func.func @transform_1(%arg0: i32, %arg1: i32) -> (i32, i32, i32) {
    %c0_i32 = arith.constant 0 : i32
    %c0_i32_0 = arith.constant 0 : i32
    %c0_i32_1 = arith.constant 0 : i32
    return %c0_i32, %c0_i32_0, %arg1 : i32, i32, i32
  }
  func.func @transform_2(%arg0: i32, %arg1: i32) -> (i32, i32) {
    %c0_i32 = arith.constant 0 : i32
    %c0_i32_0 = arith.constant 0 : i32
    return %arg1, %c0_i32 : i32, i32
  }
  func.func @transform_3(%arg0: i32, %arg1: i32) -> (i32, i32) {
    %c0_i32 = arith.constant 0 : i32
    %c0_i32_0 = arith.constant 0 : i32
    return %arg0, %c0_i32 : i32, i32
  }
}

</mosaic_0001>

<bundles_post_ra>
// kernel: tpu_custom_call.1
= control target key start
LH: loop header
LB: loop body
LE: loop exit
PB: predicated region body
PF: predicated region fallthrough
CT: control target
= control target key end

     0   :  { %s368_s0 = inlined_call_operand.vmem [shape: f32[16,32], index: 0, kind: input, shape index: {}]   ;;  %s369_s1 = inlined_call_operand.vmem [shape: f32[2,32,96], index: 1, kind: input, shape index: {}]   ;;  %s370_s2 = inlined_call_operand.vmem [shape: f32[96,32], index: 2, kind: input, shape index: {}]   ;;  %s371_s3 = inlined_call_operand.hbm [shape: f32[16,32], index: 3, kind: output, shape index: {}]  }
   0x1   :  { %v27_v0 = vld [vmem:[%s369_s1 + $0x18] sm:$0xff]  ;;  %v26_v1 = vld [vmem:[%s369_s1 + $0x10] sm:$0xff]  ;;  %v25_v2 = vld [vmem:[%s369_s1 + $0x8] sm:$0xff] }
   0x2   :  { %47 = vmatpush.msra.mxu0 %v27_v0  ;;  %v206_v3 = vld [vmem:[%s369_s1 + $0x38] sm:$0xff]  ;;  %v205_v4 = vld [vmem:[%s369_s1 + $0x30] sm:$0xff] }
   0x3   :  { %75 = vmatpush.msra.mxu1 %v206_v3 }
   0x4   :  { %48 = vmatpush.msra.mxu0 %v26_v1 }
   0x5   :  { %8 = vsyncpa [#allocation4], 0  ;;  %v24_v5 = vld [vmem:[%s369_s1] sm:$0xff]  ;;  %v204_v6 = vld [vmem:[%s369_s1 + $0x28] sm:$0xff]  ;;  %vm19_vm0 = vcmask 261120   ;;  %76 = vmatpush.msra.mxu1 %v205_v4  ;;  %v263_v28 = vmov 0.0  }
   0x6   :  { %49 = vmatpush.msra.mxu0 %v25_v2  ;;  %v22_v7 = vld [vmem:[%s368_s0] sm:$0xff]  ;;  %v23_v9 = vld [vmem:[%s368_s0 + $0x8] sm:$0xff]  ;;  %v141_v10 = vld [vmem:[%s370_s2 + $0x58] sm:$0xff]  ;;  %20 = vst.msk [vmem:[#allocation2] sm:$0xff] %vm19_vm0, %v263_v28  ;;  %vm142_vm5 = vcmask 785408   ;;  %s189_s30 = sshll.u32 %s371_s3, 4  ;;  %s190_s30 = int_to_ptr.hbm [resolvable:$true] %s189_s30 }
   0x7   :  { %v203_v8 = vld [vmem:[%s369_s1 + $0x20] sm:$0xff]  ;;  %77 = vmatpush.msra.mxu1 %v204_v6  ;;  %153 = vmatpush.msra.mxu2 %v141_v10  ;;  %v140_v11 = vld [vmem:[%s370_s2 + $0x50] sm:$0xff]  ;;  %v139_v12 = vld [vmem:[%s370_s2 + $0x48] sm:$0xff]  ;;  %21 = vst.msk [vmem:[#allocation2 + $0x8] sm:$0xff] %vm19_vm0, %v263_v28  ;;  %s265_s4 = smov 128   ;;  %s266_s5 = smov 8  }
   0x8   :  { %50 = vmatpush.msra.mxu0 %v24_v5  ;;  %213 = vmatpush.msra.mxu3 %v141_v10  ;;  %v138_v13 = vld [vmem:[%s370_s2 + $0x40] sm:$0xff]  ;;  %v137_v14 = vld [vmem:[%s370_s2 + $0x38] sm:$0xff]  ;;  %v136_v15 = vld [vmem:[%s370_s2 + $0x30] sm:$0xff] }
   0x9   :  { %201 = vmatmul.msk.f32.vlgmr.msra.gmra.mxu0 %vm19_vm0, %v22_v7  ;;  %78 = vmatpush.msra.mxu1 %v203_v8  ;;  %v135_v16 = vld [vmem:[%s370_s2 + $0x28] sm:$0xff]  ;;  %v134_v17 = vld [vmem:[%s370_s2 + $0x20] sm:$0xff]  ;;  %v133_v18 = vld [vmem:[%s370_s2 + $0x18] sm:$0xff] }
   0xa   :  { %207 = vmatmul.msk.f32.vlgmr.msra.gmra.mxu1 %vm19_vm0, %v22_v7  ;;  %154 = vmatpush.msra.mxu2 %v140_v11  ;;  %v132_v19 = vld [vmem:[%s370_s2 + $0x10] sm:$0xff]  ;;  %v131_v20 = vld [vmem:[%s370_s2 + $0x8] sm:$0xff]  ;;  %v130_v21 = vld [vmem:[%s370_s2] sm:$0xff]  ;;  %s264_s2 = smov [#allocation3]  }
   0xb   :  { %214 = vmatpush.msra.mxu3 %v140_v11  ;;  %s187_s27 = sshll.u32 %s264_s2, 4  ;;  %s188_s27 = int_to_ptr.vmem [resolvable:$true] %s187_s27 }
   0xc   :  { %155 = vmatpush.msra.mxu2 %v139_v12 }
   0xd   :  { %215 = vmatpush.msra.mxu3 %v139_v12  ;;  %v128_v57 = vld [vmem:[#allocation2] sm:$0xff] }
   0xe   :  { %156 = vmatpush.msra.mxu2 %v138_v13  ;;  %v129_v60 = vld [vmem:[#allocation2 + $0x8] sm:$0xff] }
   0xf   :  { %216 = vmatpush.msra.mxu3 %v138_v13 }
  0x10   :  { %157 = vmatpush.msra.mxu2 %v137_v14 }
  0x11   :  { %202 = vmatmul.msk.f32.gmra.mxu0 %vm19_vm0, %v23_v9  ;;  %217 = vmatpush.msra.mxu3 %v137_v14 }
  0x12   :  { %208 = vmatmul.msk.f32.gmra.mxu1 %vm19_vm0, %v23_v9  ;;  %158 = vmatpush.msra.mxu2 %v136_v15 }
  0x13   :  { %218 = vmatpush.msra.mxu3 %v136_v15 }
  0x14   :  { %159 = vmatpush.msra.mxu2 %v135_v16 }
  0x15   :  { %219 = vmatpush.msra.mxu3 %v135_v16 }
  0x16   :  { %160 = vmatpush.msra.mxu2 %v134_v17 }
  0x17   :  { %220 = vmatpush.msra.mxu3 %v134_v17 }
  0x18   :  { %161 = vmatpush.msra.mxu2 %v133_v18 }
  0x19   :  { %221 = vmatpush.msra.mxu3 %v133_v18 }
  0x1a   :  { %162 = vmatpush.msra.mxu2 %v132_v19 }
  0x1b   :  { %222 = vmatpush.msra.mxu3 %v132_v19 }
  0x1c   :  { %163 = vmatpush.msra.mxu2 %v131_v20 }
  0x1d   :  { %223 = vmatpush.msra.mxu3 %v131_v20 }
  0x1e   :  { %164 = vmatpush.msra.mxu2 %v130_v21 }
  0x1f   :  { %224 = vmatpush.msra.mxu3 %v130_v21 }
  0x86   :  { %v52_v22 = vpop.f32.mrf.mxu0 }
  0x87   :  { %v209_v23 = vmul.f32 -1.442695, %v52_v22  ;;  %v80_v40 = vpop.f32.mrf.mxu1 }
  0x89   :  { %229 = vpow2.f32 %v209_v23 }
  0x8e   :  { %v55_v24 = vpop.f32.mrf.mxu0 }
  0x8f   :  { %v230_v25 = vpop.eup %229  ;;  %v210_v26 = vmul.f32 -1.442695, %v55_v24  ;;  %v83_v54 = vpop.f32.mrf.mxu1 }
  0x90   :  { %v92_v27 = vadd.f32 1.0, %v230_v25 }
  0x91   :  { %231 = vpow2.f32 %v210_v26 }
  0x92   :  { %233 = vrcp.f32 %v92_v27  ;;  %v105_v34 = vand.u32 2147483648, %v92_v27  ;;  %v103_v36 = vand.u32 2147483647, %v92_v27  ;;  %vm99_vm2 = vweird.f32 %v92_v27 }
  0x94   :  { %v106_v39 = vor.u32 1.1754944e-38, %v105_v34  ;;  %vm104_vm4 = vcmp.eq.f32.partialorder %v103_v36, 8.507059e+37 }
  0x97   :  { %v232_v29 = vpop.eup %231 }
  0x98   :  { %v234_v30 = vpop.eup %233  ;;  %v93_v31 = vadd.f32 1.0, %v232_v29 }
  0x99   :  { %v95_v32 = vmul.f32 %v234_v30, %v92_v27  ;;  %vm100_vm1 = vweird.f32 %v234_v30 }
  0x9a   :  { %235 = vrcp.f32 %v93_v31  ;;  %vm101_vm3 = vmor %vm99_vm2, %vm100_vm1  ;;  %v120_v46 = vand.u32 2147483648, %v93_v31  ;;  %v118_v48 = vand.u32 2147483647, %v93_v31  ;;  %vm114_vm7 = vweird.f32 %v93_v31 }
  0x9b   :  { %v96_v33 = vsub.f32 1.0, %v95_v32 }
  0x9c   :  { %v121_v51 = vor.u32 1.1754944e-38, %v120_v46  ;;  %vm119_vm9 = vcmp.eq.f32.partialorder %v118_v48, 8.507059e+37 }
  0x9d   :  { %v97_v35 = vmul.f32 %v234_v30, %v96_v33 }
  0x9f   :  { %v98_v37 = vadd.f32 %v234_v30, %v97_v35 }
  0xa0   :  { %v236_v38 = vpop.eup %235 }
  0xa1   :  { %v102_v41 = vsel %vm101_vm3, %v234_v30, %v98_v37  ;;  %v110_v42 = vmul.f32 %v236_v38, %v93_v31  ;;  %vm115_vm6 = vweird.f32 %v236_v38 }
  0xa2   :  { %v107_v43 = vsel %vm104_vm4, %v106_v39, %v102_v41  ;;  %vm116_vm8 = vmor %vm114_vm7, %vm115_vm6 }
  0xa3   :  { %v124_v44 = vmul.f32 %v107_v43, %v52_v22  ;;  %v111_v45 = vsub.f32 1.0, %v110_v42 }
  0xa5   :  { %v112_v47 = vmul.f32 %v236_v38, %v111_v45  ;;  %v126_v49 = vmul.f32 %v124_v44, %v80_v40 }
  0xa7   :  { %v113_v50 = vadd.f32 %v236_v38, %v112_v47  ;;  %211 = vmatmul.msk.f32.vlgmr.msra.gmra.mxu2 %vm142_vm5, %v126_v49 }
  0xa9   :  { %v117_v52 = vsel %vm116_vm8, %v236_v38, %v113_v50 }
  0xaa   :  { %v122_v53 = vsel %vm119_vm9, %v121_v51, %v117_v52 }
  0xab   :  { %v125_v55 = vmul.f32 %v122_v53, %v55_v24 }
  0xad   :  { %v127_v56 = vmul.f32 %v125_v55, %v83_v54 }
  0xaf   :  { %212 = vmatmul.msk.f32.vlgmr.msra.gmra.mxu3 %vm142_vm5, %v127_v56 }
 0x12a   :  { %v166_v58 = vpop.f32.mrf.mxu2 }
 0x12b   :  { %v172_v59 = vadd.f32 %v166_v58, %v128_v57 }
 0x12d   :  { %174 = vst.msk [vmem:[#allocation2] sm:$0xff] %vm19_vm0, %v172_v59 }
 0x132   :  { %v169_v61 = vpop.f32.mrf.mxu3 }
 0x133   :  { %v173_v62 = vadd.f32 %v169_v61, %v129_v60 }
 0x134   :  { %v179_v63 = vld [vmem:[#allocation2] sm:$0xff] }
 0x135   :  { %175 = vst.msk [vmem:[#allocation2 + $0x8] sm:$0xff] %vm19_vm0, %v173_v62 }
 0x136   :  { %181 = vst.msk [vmem:[#allocation3] sm:$0xff] %vm19_vm0, %v179_v63 }
 0x13c   :  { %v180_v0 = vld [vmem:[#allocation2 + $0x8] sm:$0xff] }
 0x13d   :  { %182 = vst.msk [vmem:[#allocation3 + $0x8] sm:$0xff] %vm19_vm0, %v180_v0 }
 0x13e   :  { %195 = dma.vmem_to_hbm [thread:$0]  %s188_s27, 256, %s190_s30, [#allocation4], %s265_s4, %s265_s4, %s266_s5  }
 0x13f   :  { %261 = dma.done.wait [#allocation4], 256  }
 0x140   :  { %262 = vsyncadd [#allocation4], 4294967040 }
 0x141   :  { %200 = vsyncpa [#allocation4], 1 }

</bundles_post_ra>
